<compile_context>
chip_gen: v7x
topology: tpu7x:2x2x1
jax: 0.10.0
libtpu: 0.0.40
codegen_flags: <defaults>
</compile_context>

<pallas_src>
import functools

import jax
import jax.numpy as jnp
from jax.experimental import pallas as pl
from jax.experimental.pallas import tpu as pltpu


def _round_up(x, m):
    return ((x + m - 1) // m) * m


def _tpu_vmem_bytes():
    """Per-core VMEM capacity in bytes; conservative (v7x-safe) fallback."""
    try:
        return int(pltpu.get_tpu_info().vmem_capacity_bytes)
    except Exception:
        return 64 * 2**20


def _bf16_exp_ok():
    """bf16 EUP exp only on v6e / v7x; keep f32 elsewhere (v5e has no bf16 EUP)."""
    try:
        kind = jax.devices()[0].device_kind.lower()
        return ("v6" in kind) or ("v7" in kind)
    except Exception:
        return False


def _pick_tq(n, tq_max):
    tq = min(tq_max, _round_up(n, 8))
    tq = max(8, (tq // 8) * 8)
    return tq


def pam_kernel(x_nc_ref, g_ref, r_ref, vt_ref, gamma_ref, o_ref, *, bf16_exp):
    """One (batch b, query-tile j) grid step.

    x_nc_ref : (1, TQ, Cp) f32   query rows (N-major, channel-padded)
    g_ref    : (1, Cp, N)  bf16  G = (Wq^T Wk) @ x   (per-batch, resident)
    r_ref    : (1, 1, N)   f32   key-side bias row   (per-batch, resident)
    vt_ref   : (1, N, Cp)  bf16  V^T = (Wv x + bv)^T (per-batch, resident)
    gamma_ref: (1, 1)      f32   SMEM scalar
    o_ref    : (1, TQ, Cp) f32   output tile, N-major
    """
    xq = x_nc_ref[0]                                                  # (TQ, Cp) f32

    # Energy slab for this tile: (TQ, N), f32 accumulation on the MXU.
    energy = jnp.dot(xq.astype(jnp.bfloat16), g_ref[0],
                     preferred_element_type=jnp.float32)              # (TQ, N)
    energy = energy + r_ref[0]                                        # + key-side bias

    m = jnp.max(energy, axis=-1, keepdims=True)                       # (TQ, 1)
    if bf16_exp:
        # v6e / v7x: EUP is the nearest-saturated slot; bf16 exp ~2x the f32
        # rate and removes the separate p.astype(bf16) VPU pass.
        p = jnp.exp((energy - m).astype(jnp.bfloat16))                # (TQ, N) bf16
        s = jnp.sum(p, axis=-1, keepdims=True, dtype=jnp.float32)     # (TQ, 1) f32
        pm = p
    else:
        p = jnp.exp(energy - m)                                       # (TQ, N) f32
        s = jnp.sum(p, axis=-1, keepdims=True)
        pm = p.astype(jnp.bfloat16)

    out_un = jnp.dot(pm, vt_ref[0],
                     preferred_element_type=jnp.float32)              # (TQ, Cp)
    inv = pl.reciprocal(s, approx=True)                               # EUP slot

    gamma = gamma_ref[0, 0]
    o_ref[0] = (gamma * (out_un * inv) + xq).astype(o_ref.dtype)


def pam_forward(x, wq, bq, wk, bk, wv, bv, gamma, *, tq_max=None):
    """x: (B, C, H, W) float32. Returns (B, C, H, W). bk cancels in the softmax."""
    B, C, H, W = x.shape
    N = H * W

    x_cn = x.reshape(B, C, N).astype(jnp.float32)                     # (B, C, N)
    x_nc = jnp.transpose(x_cn, (0, 2, 1))                             # (B, N, C) f32

    # Fold the query/key 1x1 convs into a single C-contraction (softmax-exact).
    wqk = jnp.dot(wq.T, wk).astype(jnp.float32)                       # (C, C)
    rvec = jnp.dot(bq.T, wk).astype(jnp.float32)                      # (1, C)

    # Hoisted per-batch projections (XLA, batched over B, bf16 MXU operands).
    x_bf = x_cn.astype(jnp.bfloat16)
    g = jnp.einsum('cd,bdn->bcn', wqk.astype(jnp.bfloat16), x_bf,
                   preferred_element_type=jnp.float32).astype(jnp.bfloat16)   # (B, C, N)
    r = jnp.einsum('cd,bdn->bcn', rvec, x_cn,
                   preferred_element_type=jnp.float32)                        # (B, 1, N)
    v = jnp.einsum('cd,bdn->bcn', wv.astype(jnp.bfloat16), x_bf,
                   preferred_element_type=jnp.float32) + bv[None, :, :]       # (B, C, N)
    vt = jnp.transpose(v, (0, 2, 1)).astype(jnp.bfloat16)                     # (B, N, C)

    # Channel padding to a multiple of 128: lane-dense stores + full MXU width.
    Cp = _round_up(C, 128)
    if Cp != C:
        x_nc = jnp.pad(x_nc, [(0, 0), (0, 0), (0, Cp - C)])
        vt = jnp.pad(vt, [(0, 0), (0, 0), (0, Cp - C)])
        g = jnp.pad(g, [(0, 0), (0, Cp - C), (0, 0)])

    # Generation-aware tile size and VMEM budget.
    vmem_cap = _tpu_vmem_bytes()
    if tq_max is None:
        tq_max = 512 if vmem_cap >= 100 * 2**20 else 256
    TQ = _pick_tq(N, tq_max)
    N_pad = _round_up(N, TQ)
    NT = N_pad // TQ
    if N_pad != N:
        # Padded query rows produce garbage rows that are sliced off below.
        x_nc = jnp.pad(x_nc, [(0, 0), (0, N_pad - N), (0, 0)])

    est = (2 * Cp * N * 2            # G, double-buffered (bf16)
           + 2 * N * Cp * 2          # V^T, double-buffered (bf16)
           + 2 * 8 * N * 4           # bias row (sublane-padded), double-buffered
           + 4 * TQ * Cp * 4         # query + output tiles, double-buffered
           + 3 * TQ * N * 4)         # energy / p transients + headroom
    vmem_limit = int(min(max(est + (8 << 20), 32 << 20), vmem_cap * 3 // 4))

    gamma_s = jnp.asarray(gamma, jnp.float32).reshape(1, 1)

    grid_spec = pltpu.PrefetchScalarGridSpec(
        num_scalar_prefetch=0,
        grid=(B, NT),
        in_specs=[
            pl.BlockSpec((1, TQ, Cp), lambda b, j: (b, j, 0)),    # query rows tile
            pl.BlockSpec((1, Cp, N), lambda b, j: (b, 0, 0)),     # G (per-batch)
            pl.BlockSpec((1, 1, N), lambda b, j: (b, 0, 0)),      # bias row
            pl.BlockSpec((1, N, Cp), lambda b, j: (b, 0, 0)),     # V^T (per-batch)
            pl.BlockSpec(memory_space=pltpu.MemorySpace.SMEM),    # gamma scalar
        ],
        out_specs=pl.BlockSpec((1, TQ, Cp), lambda b, j: (b, j, 0)),
    )

    kernel = functools.partial(pam_kernel, bf16_exp=_bf16_exp_ok())

    out_nc = pl.pallas_call(
        kernel,
        out_shape=jax.ShapeDtypeStruct((B, N_pad, Cp), jnp.float32),
        grid_spec=grid_spec,
        compiler_params=pltpu.CompilerParams(
            dimension_semantics=("parallel", "parallel"),
            vmem_limit_bytes=vmem_limit,
        ),
    )(x_nc, g, r, vt, gamma_s)

    # Drop channel/row padding; back to NCHW (layout plumbing stays in XLA).
    out = out_nc[:, :N, :C]
    return jnp.transpose(out, (0, 2, 1)).reshape(B, C, H, W)


def pam_reference(x, wq, bq, wk, bk, wv, bv, gamma):
    """Pure-JAX f32 reference mirroring the PyTorch forward exactly."""
    B, C, H, W = x.shape
    N = H * W
    xf = x.reshape(B, C, N)
    q = jnp.einsum('oc,bcn->bon', wq, xf) + bq.reshape(1, -1, 1)      # (B, Cq, N)
    k = jnp.einsum('oc,bcn->bon', wk, xf) + bk.reshape(1, -1, 1)      # (B, Cq, N)
    v = jnp.einsum('oc,bcn->bon', wv, xf) + bv.reshape(1, -1, 1)      # (B, C, N)
    energy = jnp.einsum('bci,bcj->bij', q, k)                         # (B, N, N)
    attn = jax.nn.softmax(energy, axis=-1)
    out = jnp.einsum('bcj,bij->bci', v, attn)                         # (B, C, N)
    out = out.reshape(B, C, H, W)
    g = jnp.asarray(gamma, jnp.float32).reshape(1, 1)[0, 0]
    return g * out + x


if __name__ == "__main__":
    def run_case(B, C, H, W, tq_max):
        Cq = max(1, C // 8)
        key = jax.random.PRNGKey(0)
        kx, kwq, kbq, kwk, kbk, kwv, kbv = jax.random.split(key, 7)

        x = jax.random.normal(kx, (B, C, H, W), dtype=jnp.float32)
        # 1x1 conv weights stored as (Cout, Cin); biases as (Cout, 1).
        wq = 0.1 * jax.random.normal(kwq, (Cq, C), dtype=jnp.float32)
        bq = 0.1 * jax.random.normal(kbq, (Cq, 1), dtype=jnp.float32)
        wk = 0.1 * jax.random.normal(kwk, (Cq, C), dtype=jnp.float32)
        bk = 0.1 * jax.random.normal(kbk, (Cq, 1), dtype=jnp.float32)
        wv = 0.1 * jax.random.normal(kwv, (C, C), dtype=jnp.float32)
        bv = 0.1 * jax.random.normal(kbv, (C, 1), dtype=jnp.float32)
        # Module __init__ sets gamma = 0; use a nonzero value so the attention
        # path is actually exercised by the numerical check.
        gamma = jnp.array([[0.5]], dtype=jnp.float32)

        out = pam_forward(x, wq, bq, wk, bk, wv, bv, gamma, tq_max=tq_max)
        out = jax.block_until_ready(out)
        ref = pam_reference(x, wq, bq, wk, bk, wv, bv, gamma)
        assert out.shape == (B, C, H, W)
        # Tolerance covers bf16 MXU operands / bf16 exp / approx reciprocal.
        assert jnp.allclose(out, ref, atol=1e-2, rtol=1e-2), \
            f"mismatch vs reference at shape {(B, C, H, W)}"

    # Two query tiles at N=256; channel padded 16 -> 128 (lane-dense stores).
    run_case(2, 16, 16, 16, tq_max=128)
    # Ragged N = 15*17 = 255: exercises the cdiv grid + zero-padded tail path.
    run_case(1, 16, 15, 17, tq_max=128)

    print("KERNEL_OK")
</pallas_src>

<mosaic_0001>
module attributes {stable_mosaic.version = 11 : i64} {
  func.func @pam_kernel(%arg0: i32, %arg1: i32, %arg2: memref<1x128x128xf32, #tpu.memory_space<vmem>>, %arg3: memref<1x128x256xbf16, #tpu.memory_space<vmem>>, %arg4: memref<1x1x256xf32, #tpu.memory_space<vmem>>, %arg5: memref<1x256x128xbf16, #tpu.memory_space<vmem>>, %arg6: memref<1x1xf32, #tpu.memory_space<smem>>, %arg7: memref<1x128x128xf32, #tpu.memory_space<vmem>>) attributes {dimension_semantics = [#tpu.dimension_semantics<parallel>, #tpu.dimension_semantics<parallel>], iteration_bounds = array<i64: 2, 2>, scalar_prefetch = 0 : i64, scratch_operands = 0 : i64, tpu.core_type = #tpu.core_type<tc>, window_params = [{transform_indices = @transform_0, window_bounds = array<i64: 1, 128, 128>}, {transform_indices = @transform_1, window_bounds = array<i64: 1, 128, 256>}, {transform_indices = @transform_2, window_bounds = array<i64: 1, 1, 256>}, {transform_indices = @transform_3, window_bounds = array<i64: 1, 256, 128>}, {transform_indices = @transform_4, window_bounds = array<i64: 1, 1>}, {transform_indices = @transform_5, window_bounds = array<i64: 1, 128, 128>}]} {
    %c0 = arith.constant 0 : index
    %c0_0 = arith.constant 0 : index
    %c0_1 = arith.constant 0 : index
    %0 = vector.load %arg2[%c0, %c0_0, %c0_1] : memref<1x128x128xf32, #tpu.memory_space<vmem>>, vector<1x128x128xf32>
    %1 = vector.shape_cast %0 : vector<1x128x128xf32> to vector<128x128xf32>
    %2 = arith.truncf %1 : vector<128x128xf32> to vector<128x128xbf16>
    %c0_2 = arith.constant 0 : index
    %c0_3 = arith.constant 0 : index
    %c0_4 = arith.constant 0 : index
    %3 = vector.load %arg3[%c0_2, %c0_3, %c0_4] : memref<1x128x256xbf16, #tpu.memory_space<vmem>>, vector<1x128x256xbf16>
    %4 = vector.shape_cast %3 : vector<1x128x256xbf16> to vector<128x256xbf16>
    %cst = arith.constant dense<0.000000e+00> : vector<128x256xf32>
    %5 = tpu.matmul %2, %4, %cst {dimension_numbers = #tpu.dot_dimension_numbers<[1], [0], [0], [1], [0, 0, 1, 1], [], []>} : vector<128x128xbf16>, vector<128x256xbf16>, vector<128x256xf32> -> vector<128x256xf32>
    %c0_5 = arith.constant 0 : index
    %c0_6 = arith.constant 0 : index
    %c0_7 = arith.constant 0 : index
    %6 = vector.load %arg4[%c0_5, %c0_6, %c0_7] : memref<1x1x256xf32, #tpu.memory_space<vmem>>, vector<1x1x256xf32>
    %7 = vector.shape_cast %6 : vector<1x1x256xf32> to vector<1x256xf32>
    %8 = vector.broadcast %7 : vector<1x256xf32> to vector<128x256xf32>
    %9 = arith.addf %5, %8 : vector<128x256xf32>
    %cst_8 = arith.constant dense<0xFF800000> : vector<128xf32>
    %10 = vector.multi_reduction <maximumf>, %9, %cst_8 [1] : vector<128x256xf32> to vector<128xf32>
    %11 = vector.shape_cast %10 : vector<128xf32> to vector<128x1xf32>
    %12 = vector.broadcast %11 : vector<128x1xf32> to vector<128x256xf32>
    %13 = arith.subf %9, %12 : vector<128x256xf32>
    %14 = math.exp %13 : vector<128x256xf32>
    %cst_9 = arith.constant dense<0.000000e+00> : vector<128xf32>
    %15 = vector.multi_reduction <add>, %14, %cst_9 [1] : vector<128x256xf32> to vector<128xf32>
    %16 = vector.shape_cast %15 : vector<128xf32> to vector<128x1xf32>
    %17 = arith.truncf %14 : vector<128x256xf32> to vector<128x256xbf16>
    %c0_10 = arith.constant 0 : index
    %c0_11 = arith.constant 0 : index
    %c0_12 = arith.constant 0 : index
    %18 = vector.load %arg5[%c0_10, %c0_11, %c0_12] : memref<1x256x128xbf16, #tpu.memory_space<vmem>>, vector<1x256x128xbf16>
    %19 = vector.shape_cast %18 : vector<1x256x128xbf16> to vector<256x128xbf16>
    %cst_13 = arith.constant dense<0.000000e+00> : vector<128x128xf32>
    %20 = tpu.matmul %17, %19, %cst_13 {dimension_numbers = #tpu.dot_dimension_numbers<[1], [0], [0], [1], [0, 0, 1, 1], [], []>} : vector<128x256xbf16>, vector<256x128xbf16>, vector<128x128xf32> -> vector<128x128xf32>
    %21 = tpu.reciprocal %16 {approx = true} : vector<128x1xf32> -> vector<128x1xf32>
    %c0_14 = arith.constant 0 : index
    %c0_15 = arith.constant 0 : index
    %22 = memref.load %arg6[%c0_14, %c0_15] : memref<1x1xf32, #tpu.memory_space<smem>>
    %23 = vector.broadcast %21 : vector<128x1xf32> to vector<128x128xf32>
    %24 = arith.mulf %20, %23 : vector<128x128xf32>
    %25 = vector.broadcast %22 : f32 to vector<128x128xf32>
    %26 = arith.mulf %25, %24 : vector<128x128xf32>
    %27 = arith.addf %26, %1 : vector<128x128xf32>
    %c0_16 = arith.constant 0 : index
    %c0_17 = arith.constant 0 : index
    %c0_18 = arith.constant 0 : index
    %28 = vector.load %arg7[%c0_16, %c0_17, %c0_18] : memref<1x128x128xf32, #tpu.memory_space<vmem>>, vector<1x128x128xf32>
    %29 = vector.shape_cast %28 : vector<1x128x128xf32> to vector<128x128xf32>
    %30 = vector.shape_cast %27 : vector<128x128xf32> to vector<1x128x128xf32>
    tpu.vector_store %arg7[%c0_16, %c0_17, %c0_18], %30 {strides = array<i32>} : memref<1x128x128xf32, #tpu.memory_space<vmem>>, vector<1x128x128xf32>,
    return
  }
  func.func @transform_0(%arg0: i32, %arg1: i32) -> (i32, i32, i32) {
    %c0_i32 = arith.constant 0 : i32
    %c0_i32_0 = arith.constant 0 : i32
    return %arg0, %arg1, %c0_i32 : i32, i32, i32
  }
  func.func @transform_1(%arg0: i32, %arg1: i32) -> (i32, i32, i32) {
    %c0_i32 = arith.constant 0 : i32
    %c0_i32_0 = arith.constant 0 : i32
    %c0_i32_1 = arith.constant 0 : i32
    return %arg0, %c0_i32, %c0_i32_0 : i32, i32, i32
  }
  func.func @transform_2(%arg0: i32, %arg1: i32) -> (i32, i32, i32) {
    %c0_i32 = arith.constant 0 : i32
    %c0_i32_0 = arith.constant 0 : i32
    %c0_i32_1 = arith.constant 0 : i32
    return %arg0, %c0_i32, %c0_i32_0 : i32, i32, i32
  }
  func.func @transform_3(%arg0: i32, %arg1: i32) -> (i32, i32, i32) {
    %c0_i32 = arith.constant 0 : i32
    %c0_i32_0 = arith.constant 0 : i32
    %c0_i32_1 = arith.constant 0 : i32
    return %arg0, %c0_i32, %c0_i32_0 : i32, i32, i32
  }
  func.func @transform_4(%arg0: i32, %arg1: i32) -> (i32, i32) {
    %c0_i32 = arith.constant 0 : i32
    %c0_i32_0 = arith.constant 0 : i32
    %c0_i32_1 = arith.constant 0 : i32
    return %c0_i32, %c0_i32_0 : i32, i32
  }
  func.func @transform_5(%arg0: i32, %arg1: i32) -> (i32, i32, i32) {
    %c0_i32 = arith.constant 0 : i32
    %c0_i32_0 = arith.constant 0 : i32
    return %arg0, %arg1, %c0_i32 : i32, i32, i32
  }
}

</mosaic_0001>

<bundles_post_ra>
// kernel: tpu_custom_call.1
= control target key start
LH: loop header
LB: loop body
LE: loop exit
PB: predicated region body
PF: predicated region fallthrough
CT: control target
= control target key end

     0   :  { %s2592_s0 = inlined_call_operand.hbm [shape: f32[2,256,128], index: 0, kind: input, shape index: {}]   ;;  %s2593_s1 = inlined_call_operand.hbm [shape: bf16[2,128,256], index: 1, kind: input, shape index: {}]   ;;  %s2594_s2 = inlined_call_operand.vmem [shape: f32[2,1,256], index: 2, kind: input, shape index: {}]   ;;  %s2595_s3 = inlined_call_operand.hbm [shape: bf16[2,256,128], index: 3, kind: input, shape index: {}]   ;;  %s2596_s4 = inlined_call_operand.<no memory space> [shape: f32[1,1], index: 4, kind: input, shape index: {}]   ;;  %s2597_s5 = inlined_call_operand.hbm [shape: f32[2,256,128], index: 5, kind: output, shape index: {}]  }
   0x1   :  { %2618 = sst [smem:[#allocation22_spill]] %s2593_s1 }
   0x2   :  { %2619 = sst [smem:[#allocation23_spill]] %s2594_s2 }
   0x3   :  { %2620 = sst [smem:[#allocation24_spill]] %s2597_s5 }
   0x4   :  { %10 = sst [smem:[#allocation2]] %s2596_s4 }
   0x5   :  { %11 = vsyncpa [#allocation4], 0 }
   0x6   :  { %13 = vsyncpa [#allocation4 + $0x1], 0 }
   0x7   :  { %14 = vsyncpa [#allocation7], 0 }
   0x8   :  { %16 = vsyncpa [#allocation7 + $0x1], 0 }
   0x9   :  { %17 = vsyncpa [#allocation5], 0 }
   0xa   :  { %19 = vsyncpa [#allocation5 + $0x1], 0  ;;  %s1927_s20 = smov 0   ;;  %s1929_s21 = smov 0  }
   0xb   :  { %s1931_s22 = smov 0   ;;  %s1933_s23 = smov 0  }
   0xc   :  { %s1935_s24 = smov 0   ;;  %s1937_s25 = smov 0  }
   0xd   :  { %s1939_s26 = smov 0   ;;  %s1941_s4 = smov 0  }
   0xe   :  { %s1943_s27 = smov 0   ;;  %s1945_s28 = smov 0  }
   0xf   :  { %s1947_s29 = smov 0  }
  0x10 LB: > { %2621 = sst [smem:[#allocation13_spill]] %s1845_s21  ;;  %s1981_s30 = sadd.s32 4294967295, %s1881_s29   ;;  %s1881_s29 = sphi %s1947_s29, %s25_s29   ;;  %s1877_s28 = sphi %s1945_s28, %s2674_s28   ;;  %s1873_s27 = sphi %s1943_s27, %s2673_s27   ;;  %s1869_s4 = sphi %s1941_s4, %s2672_s4   ;;  %s1865_s26 = sphi %s1939_s26, %s2671_s26   ;;  %s1861_s25 = sphi %s1937_s25, %s2670_s25   ;;  %s1857_s24 = sphi %s1935_s24, %s2669_s24   ;;  %s1853_s23 = sphi %s1933_s23, %s2668_s23   ;;  %s1849_s22 = sphi %s1931_s22, %s2667_s22   ;;  %s1845_s21 = sphi %s1929_s21, %s2666_s21   ;;  %s1841_s20 = sphi %s1927_s20, %s2664_s20  }
  0x11   : > { %2622 = sst [smem:[#allocation14_spill]] %s1853_s23  ;;  %p2601_p0 = scmp.eq.s32.totalorder %s1881_s29, 0 }
  0x12   : > { %2623 = sst [smem:[#allocation15_spill]] %s1865_s26  ;;  %p2600_p1 = scmp.eq.s32.totalorder %s1981_s30, 0 }
  0x13   : > { %2624 = sst [smem:[#allocation16_spill]] %s1869_s4  ;;  %p79_p2 = scmp.ne.s32.totalorder %s1849_s22, %s1845_s21 }
  0x14   : > { %2625 = sst [smem:[#allocation17_spill]] %s1981_s30  ;;  %p85_p3 = scmp.ne.s32.totalorder %s1845_s21, %s1841_s20 }
  0x15   : > { %p81_p4 = por %p79_p2, %p2601_p0  ;;  %p2599_p5 = scmp.lt.s32.totalorder %s1881_s29, 4 }
  0x16   : > { %p1995_p6 = por %p85_p3, %p2600_p1  ;;  %s236_s9 = sand.u32 1, %s1881_s29  }
  0x17   : > { %s238_s10 = sand.u32 1, %s1849_s22   ;;  %s1338_s12 = sshll.u32 %s1877_s28, 11 }
  0x18   : > { %s2626_s8 = scalar_select %p1995_p6, 1, 0 }
  0x19   : > { %s2001_s11 = sshll.u32 %s238_s10, 7  ;;  %s2628_s1 = sld [smem:[#allocation22_spill]] }
  0x1a   : > { %2627 = sst [smem:[#allocation18_spill]] %s2626_s8  ;;  %s240_s16 = scalar_lea.vmem [#allocation6], %s2001_s11 }
  0x1b   : > { %s247_s17 = sshll.u32 %s240_s16, 4  ;;  %p2012_p7 = pnand %p2599_p5, %p81_p4  ;;  %s2016_s17 = int_to_ptr.vmem [resolvable:$true] %s247_s17 }
  0x1c   : > { %s2021_s10 = scalar_lea.hbm %s2595_s3, %s1338_s12  ;;  %s2023_s13 = scalar_lea.sflag [#allocation7], %s236_s9 }
  0x1d   : > { %p2602_p9 = pneg %p2012_p7 }
  0x1f   : > { %s2007_s15 = scalar_lea.hbm %s2628_s1, %s1338_s12  ;;  %s1670_s6 = scalar_lea.hbm %s2628_s1, 4096 }
  0x20   : > { %s1665_s14 = scalar_lea.hbm %s2007_s15, 2048  ;;  %p1671_p12 = scmp.lt.u32.totalorder %s2007_s15, %s2628_s1 }
  0x21   : > { %p1666_p8 = scmp.ne.s32.totalorder %s2007_s15, %s1665_s14  ;;  %p1672_p13 = scmp.lt.u32.totalorder %s1670_s6, %s1665_s14 }
  0x22   : > { %p1674_p3 = scmp.lt.u32.totalorder %s1665_s14, %s2007_s15 }
  0x23   : > { %p1668_p10 = pnand %p2602_p9, %p1666_p8  ;;  %p1673_p2 = por %p1672_p13, %p1671_p12 }
  0x25   : > { %p1669_p11 = pneg %p1668_p10  ;;  %p1675_p4 = por %p1674_p3, %p1673_p2 }
  0x27   : > { %p1676_p5 = pnand %p1675_p4, %p1669_p11 }
  0x29   : > { %1679 = shalt.err (!%p1676_p5)
}
  0x2a   : > { %s1680_s9 = scalar_lea.vmem %s2016_s17, 2048  ;;  %s1883_s7 = smov [#allocation6]  }
  0x2b   : > { %p1681_p8 = scmp.ne.s32.totalorder %s2016_s17, %s1680_s9  ;;  %s1685_s12 = sshll.u32 %s1883_s7, 4  ;;  %s1686_s12 = int_to_ptr.vmem [resolvable:$false] %s1685_s12 }
  0x2c   : > { %s1687_s5 = scalar_lea.vmem %s1686_s12, 4096  ;;  %p1688_p0 = scmp.lt.s32.totalorder %s2016_s17, %s1686_s12 }
  0x2d   : > { %p1683_p10 = pnand %p1681_p8, %p2602_p9  ;;  %p1689_p12 = scmp.lt.s32.totalorder %s1687_s5, %s1680_s9 }
  0x2f   : > { %p1684_p1 = pneg %p1683_p10  ;;  %p1690_p13 = por %p1689_p12, %p1688_p0 }
  0x31   : > { %p1691_p2 = pnand %p1690_p13, %p1684_p1 }
  0x33   : > { %1694 = shalt.err (!%p1691_p2)
}
  0x34   : > { %s2603_s26 = smov 128   ;;  %s2604_s6 = smov 8  }
  0x35   : > { %1418 = dma.hbm_to_vmem [thread:$0]  (!%p2012_p7), %s2007_s15, 2048, %s2016_s17, %s2023_s13, %s2603_s26, %s2603_s26, %s2604_s6  }
  0x36   : > { %s268_s19 = scalar_lea.vmem [#allocation8], %s2001_s11  ;;  %p1294_p0 = scmp.ge.s32.totalorder %s1881_s29, 1 }
  0x37   : > { %s275_s20 = sshll.u32 %s268_s19, 4  ;;  %p283_p1 = scmp.lt.s32.totalorder %s1881_s29, 5  ;;  %s2056_s20 = int_to_ptr.vmem [resolvable:$true] %s275_s20 }
  0x38   : > { %s1281_s16 = sadd.s32 4294967294, %s1881_s29   ;;  %s34_s9 = sadd.s32 1, %s1873_s27 }
  0x39   : > { %p2059_p5 = pnand %p1294_p0, %p283_p1  ;;  %s46_s7 = sadd.s32 1, %s1861_s25 }
  0x3a   : > { %p35_p11 = scmp.ge.s32.totalorder %s34_s9, 2  ;;  %p53_p3 = scmp.ne.s32.totalorder %s1861_s25, %s1857_s24 }
  0x3b   : > { %s2630_s14 = scalar_select %p2059_p5, 1, 0 }
  0x3c   : > { %p59_p4 = scmp.ne.s32.totalorder %s1857_s24, %s1853_s23  ;;  %p184_p8 = scmp.eq.s32.totalorder %s1981_s30, 3 }
  0x3d   : > { %s2676_s9 = smov (%p35_p11, %s34_s9), 0  ;;  %s2632_s11 = sadd.s32 1, %s1877_s28 }
  0x3e   : > { %2631 = sst [smem:[#allocation19_spill]] %s2676_s9  ;;  %s2678_s11 = smov (!%p35_p11, %s2632_s11), %s1877_s28 }
  0x3f   : > { %s42_s15 = ssub.s32 %s1873_s27, %s2676_s9  ;;  %p2633_p10 = scmp.eq.s32.totalorder %s1881_s29, 0 }
  0x40   : > { %p39_p13 = scmp.ge.s32.totalorder %s2678_s11, 2  ;;  %p2635_p2 = scmp.eq.s32.totalorder %s1981_s30, 0 }
  0x41   : > { %p2080_p12 = por %p2633_p10, %p53_p3  ;;  %p2090_p1 = por %p184_p8, %p53_p3 }
  0x42   : > { %p2086_p0 = por %p2635_p2, %p59_p4  ;;  %p190_p11 = scmp.eq.s32.totalorder %s1281_s16, 3 }
  0x43   : > { %s2637_s5 = scalar_select %p2090_p1, 1, 0 }
  0x44   : > { %s2636_s12 = scalar_select %p2086_p0, 1, 0 }
  0x45   : > { %2638 = sst [smem:[#allocation20_spill]] %s2637_s5  ;;  %s2680_s11 = smov (%p39_p13, %s2678_s11), 0 }
  0x46   : > { %p2096_p9 = por %p190_p11, %p59_p4  ;;  %s213_s26 = sand.u32 1, %s1861_s25  }
  0x47   : > { %s41_s6 = ssub.s32 %s1877_s28, %s2680_s11  ;;  %s1284_s9 = sshll.u32 %s213_s26, 7 }
  0x48   : > { %s2639_s19 = scalar_select %p2096_p9, 1, 0 }
  0x49   : > { %s43_s1 = sor.u32 %s42_s15, %s41_s6  ;;  %p70_p10 = scmp.eq.s32.totalorder %s41_s6, 0 }
  0x4a   : > { %2640 = sst [smem:[#allocation21_spill]] %s2639_s19  ;;  %p44_p2 = scmp.eq.s32.totalorder %s43_s1, 0 }
  0x4b   : > { %s2641_s23 = sadd.s32 1, %s1849_s22  ;;  %s1285_s16 = sshll.u32 %s1873_s27, 4 }
  0x4c   : > { %s2106_s2 = scalar_select %p70_p10, %s1849_s22, %s2641_s23  }
  0x4d   : > { %s2109_s5 = scalar_select %p44_p2, %s1861_s25, %s46_s7  }
  0x4e   : > { %s1286_s4 = sshll.u32 %s1877_s28, 5  ;;  %s217_s8 = scalar_lea.vmem [#allocation3], %s1284_s9 }
  0x4f   : > { %s226_s21 = sshll.u32 %s217_s8, 4  ;;  %s223_s30 = sadd.s32 %s1286_s4, %s1285_s16  ;;  %s2113_s21 = int_to_ptr.vmem [resolvable:$true] %s226_s21 }
  0x50   : > { %s1287_s19 = sshll.u32 %s223_s30, 7  ;;  %p2642_p3 = scmp.lt.s32.totalorder %s1881_s29, 4 }
  0x51   : > { %s2126_s23 = scalar_lea.hbm %s2592_s0, %s1287_s19  ;;  %s2128_s4 = scalar_lea.sflag [#allocation4], %s213_s26 }
  0x52   : > { %p2119_p4 = pnand %p2642_p3, %p2080_p12  ;;  %s1695_s30 = scalar_lea.hbm %s2126_s23, 2048 }
  0x53   : > { %p1696_p8 = scmp.ne.s32.totalorder %s2126_s23, %s1695_s30  ;;  %s1700_s7 = scalar_lea.hbm %s2592_s0, 8192 }
  0x54   : > { %p1697_p12 = pneg %p2119_p4  ;;  %p1701_p10 = scmp.lt.u32.totalorder %s2126_s23, %s2592_s0 }
  0x55   : > { %p1702_p2 = scmp.lt.u32.totalorder %s1700_s7, %s1695_s30  ;;  %p1704_p9 = scmp.lt.u32.totalorder %s1695_s30, %s2126_s23 }
  0x56   : > { %p1698_p13 = pnand %p1697_p12, %p1696_p8 }
  0x57   : > { %p1703_p3 = por %p1702_p2, %p1701_p10 }
  0x58   : > { %p1699_p11 = pneg %p1698_p13 }
  0x59   : > { %p1705_p1 = por %p1704_p9, %p1703_p3 }
  0x5b   : > { %p1706_p6 = pnand %p1705_p1, %p1699_p11 }
  0x5d   : > { %1709 = shalt.err (!%p1706_p6)
}
  0x5e   : > { %s1710_s26 = scalar_lea.vmem %s2113_s21, 2048  ;;  %s1886_s16 = smov [#allocation3]  }
  0x5f   : > { %p1711_p8 = scmp.ne.s32.totalorder %s2113_s21, %s1710_s26  ;;  %s1715_s1 = sshll.u32 %s1886_s16, 4  ;;  %s1716_s1 = int_to_ptr.vmem [resolvable:$false] %s1715_s1 }
  0x60   : > { %s1717_s6 = scalar_lea.vmem %s1716_s1, 4096  ;;  %p1718_p5 = scmp.lt.s32.totalorder %s2113_s21, %s1716_s1 }
  0x61   : > { %p1713_p13 = pnand %p1711_p8, %p1697_p12  ;;  %p1719_p10 = scmp.lt.s32.totalorder %s1717_s6, %s1710_s26 }
  0x63   : > { %p1714_p0 = pneg %p1713_p13  ;;  %p1720_p2 = por %p1719_p10, %p1718_p5 }
  0x65   : > { %p1721_p9 = pnand %p1720_p2, %p1714_p0 }
  0x67   : > { %1724 = shalt.err (!%p1721_p9)
}
  0x68   : > { %s2644_s30 = smov 8   ;;  %s2645_s8 = smov 128  }
  0x69   : > { %1415 = dma.hbm_to_vmem [thread:$0]  (!%p2119_p4), %s2126_s23, 2048, %s2113_s21, %s2128_s4, %s2645_s8, %s2645_s8, %s2644_s30  }
  0x6a   : > { %s1725_s9 = scalar_lea.hbm %s2021_s10, 2048  ;;  %p2646_p5 = pneg %p2012_p7 }
  0x6b   : > { %p1726_p6 = scmp.ne.s32.totalorder %s2021_s10, %s1725_s9  ;;  %s1730_s17 = scalar_lea.hbm %s2595_s3, 4096 }
  0x6c   : > { %p1731_p12 = scmp.lt.u32.totalorder %s2021_s10, %s2595_s3  ;;  %p1732_p11 = scmp.lt.u32.totalorder %s1730_s17, %s1725_s9 }
  0x6d   : > { %p1728_p0 = pnand %p1726_p6, %p2646_p5  ;;  %p1734_p8 = scmp.lt.u32.totalorder %s1725_s9, %s2021_s10 }
  0x6e   : > { %p1733_p3 = por %p1732_p11, %p1731_p12 }
  0x6f   : > { %p1729_p1 = pneg %p1728_p0 }
  0x70   : > { %p1735_p13 = por %p1734_p8, %p1733_p3 }
  0x72   : > { %p1736_p10 = pnand %p1735_p13, %p1729_p1 }
  0x74   : > { %1739 = shalt.err (!%p1736_p10)
}
  0x75   : > { %s1740_s21 = scalar_lea.vmem %s2056_s20, 2048  ;;  %p2647_p2 = pmov %p2646_p5 }
  0x76   : > { %p1741_p4 = scmp.ne.s32.totalorder %s2056_s20, %s1740_s21  ;;  %s1887_s23 = smov [#allocation8]  }
  0x77   : > { %s1745_s4 = sshll.u32 %s1887_s23, 4  ;;  %s1746_s4 = int_to_ptr.vmem [resolvable:$false] %s1745_s4 }
  0x78   : > { %p1743_p9 = pnand %p1741_p4, %p2647_p2  ;;  %s1747_s16 = scalar_lea.vmem %s1746_s4, 4096 }
  0x79   : > { %p1748_p5 = scmp.lt.s32.totalorder %s2056_s20, %s1746_s4  ;;  %p1749_p0 = scmp.lt.s32.totalorder %s1747_s16, %s1740_s21 }
  0x7a   : > { %p1744_p6 = pneg %p1743_p9 }
  0x7b   : > { %p1750_p12 = por %p1749_p0, %p1748_p5 }
  0x7d   : > { %p1751_p11 = pnand %p1750_p12, %p1744_p6 }
  0x7f   : > { %1754 = shalt.err (!%p1751_p11)
}
  0x80   : > { %s1888_s1 = smov 64   ;;  %s1889_s6 = smov 4  }
  0x81   : > { %1421 = dma.hbm_to_vmem [thread:$0]  (!%p2012_p7), %s2021_s10, 2048, %s2056_s20, %s2023_s13, %s1888_s1, %s1888_s1, %s1889_s6  }
  0x82   : > { %p2648_p1 = scmp.ne.s32.totalorder %s2630_s14, 0 }
  0x83   : > { %s2186_s30 = sand.u32 (!%p2648_p1), 1, %s1857_s24   ;;  %p2649_p3 = scmp.ne.s32.totalorder (!%p2648_p1), %s2636_s12, 0 }
  0x84   : > { %287 = sbr.rel (%p2648_p1) target bundleno = 860 (0x35c), region = 40  ;;  %s1295_s8 = sshll.u32 (!%p2648_p1), %s2186_s30, 7 }
  0x85   : > { %s290_s9 = scalar_lea.sflag (!%p2648_p1), [#allocation4], %s2186_s30  ;;  %s2192_s7 = scalar_lea.vmem (!%p2648_p1), [#allocation3], %s1295_s8 }
  0x8b   : > { %1828 = dma.done.wait (%p2649_p3), %s290_s9, 2048  }
  0x8c   : > { %1830 = vsyncadd (%p2649_p3), %s290_s9, 4294965248  ;;  %s2650_s18 = sld [smem:[#allocation17_spill]]  ;;  %s2651_s10 = sld [smem:[#allocation13_spill]] }
  0x8d   : > { %s2652_s13 = sld [smem:[#allocation18_spill]] }
  0x92   : > { %s298_s20 = sand.u32 1, %s2650_s18   ;;  %s300_s14 = sand.u32 1, %s2651_s10  }
  0x93   : > { %s2200_s15 = sshll.u32 %s300_s14, 7  ;;  %s299_s17 = scalar_lea.sflag [#allocation7], %s298_s20 }
  0x94   : > { %s2203_s19 = scalar_lea.vmem [#allocation6], %s2200_s15  ;;  %p2653_p7 = scmp.ne.s32.totalorder %s2652_s13, 0 }
  0x96   : > { %1832 = dma.done.wait (%p2653_p7), %s299_s17, 4096  }
  0x97   : > { %1834 = vsyncadd (%p2653_p7), %s299_s17, 4294963200  ;;  %v1890_v0 = vmov 0   ;;  %v1523_v1 = vld [vmem:[%s2203_s19 + $0x4] ss:$8 sps:$4 sm:$0xff]   ;;  %v1525_v2 = vld [vmem:[%s2203_s19] ss:$8 sps:$4 sm:$0xff]   ;;  %v401_v47 = vlaneseq }
  0x98   : > { %523 = vmatprep.mubr.bf16.mxu0 %v1890_v0  ;;  %491 = vmatprep.subr.bf16.mxu0 %v1523_v1  ;;  %v1526_v3 = vld [vmem:[%s2203_s19 + $0x14] ss:$8 sps:$4 sm:$0xff]   ;;  %v1528_v4 = vld [vmem:[%s2203_s19 + $0x10] ss:$8 sps:$4 sm:$0xff]   ;;  %v1529_v5 = vld [vmem:[%s2203_s19 + $0x24] ss:$8 sps:$4 sm:$0xff]  }
  0x99   : > { %492 = vmatpush1.bf16.msra.mxu0 %v1525_v2  ;;  %v1531_v6 = vld [vmem:[%s2203_s19 + $0x20] ss:$8 sps:$4 sm:$0xff]   ;;  %v1532_v7 = vld [vmem:[%s2203_s19 + $0x34] ss:$8 sps:$4 sm:$0xff]   ;;  %v1534_v8 = vld [vmem:[%s2203_s19 + $0x30] ss:$8 sps:$4 sm:$0xff]  }
  0x9a   : > { %493 = vmatprep.subr.bf16.mxu0 %v1526_v3  ;;  %v1535_v9 = vld [vmem:[%s2203_s19 + $0x44] ss:$8 sps:$4 sm:$0xff]   ;;  %v1537_v10 = vld [vmem:[%s2203_s19 + $0x40] ss:$8 sps:$4 sm:$0xff]   ;;  %v1538_v11 = vld [vmem:[%s2203_s19 + $0x54] ss:$8 sps:$4 sm:$0xff]  }
  0x9b   : > { %v1540_v12 = vld [vmem:[%s2203_s19 + $0x50] ss:$8 sps:$4 sm:$0xff]   ;;  %v1541_v13 = vld [vmem:[%s2203_s19 + $0x64] ss:$8 sps:$4 sm:$0xff]   ;;  %v1543_v14 = vld [vmem:[%s2203_s19 + $0x60] ss:$8 sps:$4 sm:$0xff]  }
  0x9c   : > { %v1544_v15 = vld [vmem:[%s2203_s19 + $0x74] ss:$8 sps:$4 sm:$0xff]   ;;  %v1546_v16 = vld [vmem:[%s2203_s19 + $0x70] ss:$8 sps:$4 sm:$0xff]   ;;  %v2227_v17 = vld [vmem:[%s2192_s7] sm:$0xff]  ;;  %s2654_s12 = sld [smem:[#allocation16_spill]] }
  0x9d   : > { %494 = vmatpush1.bf16.msra.mxu0 %v1528_v4  ;;  %v2230_v18 = vld [vmem:[%s2192_s7 + $0x8] sm:$0xff]  ;;  %v2236_v20 = vld [vmem:[%s2192_s7 + $0x10] sm:$0xff]  ;;  %v2239_v21 = vld [vmem:[%s2192_s7 + $0x18] sm:$0xff]  ;;  %s2280_s26 = scalar_lea.vmem [#allocation8], %s2200_s15  ;;  %v402_v48 = vshrl.u32 %v401_v47, 7  ;;  %s2655_s1 = sld [smem:[#allocation23_spill]] }
  0x9e   : > { %495 = vmatprep.subr.bf16.mxu0 %v1529_v5  ;;  %v375_v19 = vpack.c.bf16 %v2230_v18, %v2227_v17  ;;  %v376_v22 = vpack.c.bf16 %v2239_v21, %v2236_v20  ;;  %v2245_v23 = vld [vmem:[%s2192_s7 + $0x20] sm:$0xff]  ;;  %v2248_v24 = vld [vmem:[%s2192_s7 + $0x28] sm:$0xff]  ;;  %v2254_v26 = vld [vmem:[%s2192_s7 + $0x30] sm:$0xff]  ;;  %s1053_s9 = sld [smem:[#allocation2]]  ;;  %s2474_s18 = scalar_lea.vmem [#allocation9], %s1295_s8 }
  0x9f   : > { %v377_v25 = vpack.c.bf16 %v2248_v24, %v2245_v23  ;;  %v2257_v27 = vld [vmem:[%s2192_s7 + $0x38] sm:$0xff]  ;;  %v2263_v29 = vld [vmem:[%s2192_s7 + $0x40] sm:$0xff]  ;;  %v2266_v30 = vld [vmem:[%s2192_s7 + $0x48] sm:$0xff]  ;;  %v403_v49 = vsub.s32 0, %v402_v48  ;;  %v407_v51 = vsub.s32 1, %v402_v48  ;;  %s2656_s8 = sld [smem:[#allocation15_spill]] }
  0xa0   : > { %v378_v28 = vpack.c.bf16 %v2257_v27, %v2254_v26  ;;  %v379_v31 = vpack.c.bf16 %v2266_v30, %v2263_v29  ;;  %v369_v32 = vld [vmem:[%s2192_s7 + $0x50] sm:$0xff]  ;;  %v370_v33 = vld [vmem:[%s2192_s7 + $0x58] sm:$0xff]  ;;  %v371_v35 = vld [vmem:[%s2192_s7 + $0x60] sm:$0xff]  ;;  %s2657_s14 = sld [smem:[#allocation20_spill]]  ;;  %s1135_s17 = sshll.u32 %s2474_s18, 4  ;;  %s2526_s17 = int_to_ptr.vmem [resolvable:$true] %s1135_s17 }
  0xa1   : > { %496 = vmatpush1.bf16.msra.mxu0 %v1531_v6  ;;  %v380_v34 = vpack.c.bf16 %v370_v33, %v369_v32  ;;  %v372_v36 = vld [vmem:[%s2192_s7 + $0x68] sm:$0xff]  ;;  %v373_v38 = vld [vmem:[%s2192_s7 + $0x70] sm:$0xff]  ;;  %v374_v39 = vld [vmem:[%s2192_s7 + $0x78] sm:$0xff]  ;;  %s1755_s4 = scalar_lea.vmem %s2526_s17, 2048 }
  0xa2   : > { %497 = vmatprep.subr.bf16.mxu0 %v1532_v7  ;;  %v381_v37 = vpack.c.bf16 %v372_v36, %v371_v35  ;;  %v382_v40 = vpack.c.bf16 %v374_v39, %v373_v38  ;;  %v1547_v41 = vld [vmem:[%s2280_s26 + $0x40] sm:$0xff]   ;;  %v1549_v43 = vld [vmem:[%s2280_s26 + $0x48] sm:$0xff]   ;;  %v1551_v45 = vld [vmem:[%s2280_s26 + $0x50] sm:$0xff]   ;;  %p353_p8 = scmp.lt.s32.totalorder %s2654_s12, 1  ;;  %s1334_s13 = sshll.u32 %s2654_s12, 5 }
  0xa3   : > { %v1548_v42 = vld [vmem:[%s2280_s26] sm:$0xff]   ;;  %1340 = vmatprep.subr.bf16.mxu1 %v1547_v41  ;;  %v1550_v44 = vld [vmem:[%s2280_s26 + $0x8] sm:$0xff]   ;;  %v1552_v46 = vld [vmem:[%s2280_s26 + $0x10] sm:$0xff]   ;;  %p1756_p13 = scmp.ne.s32.totalorder %s2526_s17, %s1755_s4 }
  0xa4   : > { %1341 = vmatpush3.bf16.msra.mxu1 %v1548_v42  ;;  %s354_s21 = scalar_select %p353_p8, %s2654_s12, 1  ;;  %v1555_v35 = vld [vmem:[%s2280_s26 + $0x60] sm:$0xff]  }
  0xa5   : > { %498 = vmatpush1.bf16.msra.mxu0 %v1534_v8  ;;  %1342 = vmatprep.subr.bf16.mxu1 %v1549_v43  ;;  %v1556_v38 = vld [vmem:[%s2280_s26 + $0x20] sm:$0xff]   ;;  %v1557_v43 = vld [vmem:[%s2280_s26 + $0x68] sm:$0xff]   ;;  %s1333_s10 = sshll.u32 %s2656_s8, 4 }
  0xa6   : > { %499 = vmatprep.subr.bf16.mxu0 %v1535_v9  ;;  %s1299_s23 = sshll.u32 %s354_s21, 1  ;;  %s1132_s20 = sadd.s32 %s1334_s13, %s1333_s10 }
  0xa7   : > { %s356_s6 = scalar_lea.vmem %s2655_s1, %s1299_s23  ;;  %s1335_s15 = sshll.u32 %s1132_s20, 7 }
  0xa8   : > { %1343 = vmatpush3.bf16.msra.mxu1 %v1550_v44  ;;  %v399_v50 = vld [vmem:[%s356_s6] sm:$0x3]  ;;  %s1120_s23 = scalar_lea.sflag [#allocation5], %s2186_s30  ;;  %p2660_p10 = scmp.ne.s32.totalorder %s2657_s14, 0 }
  0xa9   : > { %500 = vmatpush1.bf16.msra.mxu0 %v1537_v10  ;;  %1344 = vmatprep.subr.bf16.mxu1 %v1551_v45  ;;  %v2293_v52 = vrot.slane %v399_v50, %v403_v49  ;;  %v2295_v53 = vrot.slane %v399_v50, %v407_v51  ;;  %v1558_v45 = vld [vmem:[%s2280_s26 + $0x28] sm:$0xff]   ;;  %v1559_v49 = vld [vmem:[%s2280_s26 + $0x70] sm:$0xff]   ;;  %s1891_s1 = smov [#allocation9]  }
  0xaa   : > { %501 = vmatprep.subr.bf16.mxu0 %v1538_v11  ;;  %p1757_p4 = pnand %p1756_p13, %p2660_p10  ;;  %s1759_s6 = sshll.u32 %s1891_s1, 4  ;;  %s1760_s6 = int_to_ptr.vmem [resolvable:$false] %s1759_s6 }
  0xab   : > { %p1762_p9 = scmp.lt.s32.totalorder %s2526_s17, %s1760_s6 }
  0xac   : > { %1345 = vmatpush3.bf16.msra.mxu1 %v1552_v46  ;;  %p1758_p2 = pneg %p1757_p4 }
  0xad   : > { %502 = vmatpush1.bf16.msra.mxu0 %v1540_v12 }
  0xae   : > { %503 = vmatprep.subr.bf16.mxu0 %v1541_v13 }
  0xb1   : > { %504 = vmatpush1.bf16.msra.mxu0 %v1543_v14 }
  0xb2   : > { %505 = vmatprep.subr.bf16.mxu0 %v1544_v15 }
  0xb5   : > { %506 = vmatpush1.bf16.msra.mxu0 %v1546_v16 }
  0xb8   : > { %524 = vmatmul.mubr.bf16.vlgmr.msra.gmra.mrb[0].mxu0 %v375_v19 }
  0xb9   : > { %533 = vmatprep.mubr.bf16.mxu0 %v1890_v0 }
  0xc0   : > { %534 = vmatmul.mubr.bf16.gmra.mrb[4].mxu0 %v376_v22 }
  0xc1   : > { %543 = vmatprep.mubr.bf16.mxu0 %v1890_v0 }
  0xc8   : > { %544 = vmatmul.mubr.bf16.gmra.mrb[8].mxu0 %v377_v25  ;;  %v1553_v25 = vld [vmem:[%s2280_s26 + $0x58] sm:$0xff]  }
  0xc9   : > { %553 = vmatprep.mubr.bf16.mxu0 %v1890_v0  ;;  %1346 = vmatprep.subr.bf16.mxu1 %v1553_v25 }
  0xd0   : > { %554 = vmatmul.mubr.bf16.gmra.mrb[12].mxu0 %v378_v28 }
  0xd1   : > { %563 = vmatprep.mubr.bf16.mxu0 %v1890_v0 }
  0xd8   : > { %564 = vmatmul.mubr.bf16.gmra.mrb[16].mxu0 %v379_v31  ;;  %v1554_v31 = vld [vmem:[%s2280_s26 + $0x18] sm:$0xff]  }
  0xd9   : > { %573 = vmatprep.mubr.bf16.mxu0 %v1890_v0  ;;  %1347 = vmatpush3.bf16.msra.mxu1 %v1554_v31 }
  0xda   : > { %1348 = vmatprep.subr.bf16.mxu1 %v1555_v35 }
  0xdd   : > { %1349 = vmatpush3.bf16.msra.mxu1 %v1556_v38 }
  0xde   : > { %1350 = vmatprep.subr.bf16.mxu1 %v1557_v43 }
  0xe0   : > { %574 = vmatmul.mubr.bf16.gmra.mrb[20].mxu0 %v380_v34 }
  0xe1   : > { %583 = vmatprep.mubr.bf16.mxu0 %v1890_v0  ;;  %1351 = vmatpush3.bf16.msra.mxu1 %v1558_v45 }
  0xe2   : > { %1352 = vmatprep.subr.bf16.mxu1 %v1559_v49 }
  0xe8   : > { %584 = vmatmul.mubr.bf16.gmra.mrb[24].mxu0 %v381_v37 }
  0xe9   : > { %593 = vmatprep.mubr.bf16.mxu0 %v1890_v0 }
  0xf0   : > { %594 = vmatmul.mubr.bf16.gmra.mrb[28].mxu0 %v382_v40 }
 0x18b   : > { %v525_v54 = vpop.f32.mrb[0].mxu0 }
 0x18c   : > { %v2298_v55 = vadd.f32 %v525_v54, %v2293_v52  ;;  %v527_v56 = vpop.f32.mrb[1].mxu0  ;;  %v1560_v54 = vld [vmem:[%s2280_s26 + $0x30] sm:$0xff]  }
 0x18d   : > { %v2301_v57 = vadd.f32 %v527_v56, %v2295_v53  ;;  %v529_v58 = vpop.f32.mrb[2].mxu0  ;;  %1353 = vmatpush3.bf16.msra.mxu1 %v1560_v54 }
 0x18e   : > { %v531_v59 = vpop.f32.mrb[3].mxu0  ;;  %v2304_v60 = vadd.f32 %v529_v58, %v2293_v52 }
 0x18f   : > { %v2307_v61 = vadd.f32 %v531_v59, %v2295_v53  ;;  %v604_v62 = vmax.f32 %v2298_v55, %v2301_v57 }
 0x191   : > { %605 = vmax.xlane.f32.xlu0 %v604_v62  ;;  %v607_v0 = vmax.f32 %v2304_v60, %v2307_v61 }
 0x193   : > { %v535_v63 = vpop.f32.mrb[4].mxu0 }
 0x194   : > { %v2314_v1 = vadd.f32 %v535_v63, %v2293_v52  ;;  %v537_v2 = vpop.f32.mrb[5].mxu0  ;;  %v1561_v63 = vld [vmem:[%s2280_s26 + $0x78] sm:$0xff]  }
 0x195   : > { %v2317_v3 = vadd.f32 %v537_v2, %v2295_v53  ;;  %v539_v4 = vpop.f32.mrb[6].mxu0  ;;  %608 = vmax.xlane.f32.xlu0 %v607_v0  ;;  %v1562_v2 = vld [vmem:[%s2280_s26 + $0x38] sm:$0xff]   ;;  %1354 = vmatprep.subr.bf16.mxu1 %v1561_v63  ;;  %s2658_s26 = sld [smem:[#allocation24_spill]] }
 0x196   : > { %v541_v5 = vpop.f32.mrb[7].mxu0  ;;  %v2320_v6 = vadd.f32 %v539_v4, %v2293_v52  ;;  %1355 = vmatpush3.bf16.msra.mxu1 %v1562_v2 }
 0x197   : > { %v2323_v7 = vadd.f32 %v541_v5, %v2295_v53  ;;  %v610_v8 = vmax.f32 %v2314_v1, %v2317_v3 }
 0x199   : > { %611 = vmax.xlane.f32.xlu1 %v610_v8  ;;  %v613_v10 = vmax.f32 %v2320_v6, %v2323_v7 }
 0x19b   : > { %v545_v9 = vpop.f32.mrb[8].mxu0  ;;  %s2659_s16 = smov %s2658_s26  ;;  %s2524_s21 = scalar_lea.hbm %s2658_s26, %s1335_s15 }
 0x19c   : > { %v2330_v11 = vadd.f32 %v545_v9, %v2293_v52  ;;  %v547_v12 = vpop.f32.mrb[9].mxu0 }
 0x19d   : > { %v2333_v13 = vadd.f32 %v547_v12, %v2295_v53  ;;  %v549_v14 = vpop.f32.mrb[10].mxu0  ;;  %614 = vmax.xlane.f32.xlu1 %v613_v10 }
 0x19e   : > { %v2336_v15 = vadd.f32 %v549_v14, %v2293_v52  ;;  %v551_v16 = vpop.f32.mrb[11].mxu0 }
 0x19f   : > { %v2339_v19 = vadd.f32 %v551_v16, %v2295_v53  ;;  %v616_v22 = vmax.f32 %v2330_v11, %v2333_v13 }
 0x1a1   : > { %617 = vmax.xlane.f32.xlu0 %v616_v22  ;;  %v619_v28 = vmax.f32 %v2336_v15, %v2339_v19 }
 0x1a3   : > { %v555_v32 = vpop.f32.mrb[12].mxu0  ;;  %620 = vmax.xlane.f32.xlu1 %v619_v28 }
 0x1a4   : > { %v2348_v33 = vadd.f32 %v555_v32, %v2293_v52  ;;  %v557_v34 = vpop.f32.mrb[13].mxu0 }
 0x1a5   : > { %v2352_v36 = vadd.f32 %v557_v34, %v2295_v53  ;;  %v559_v37 = vpop.f32.mrb[14].mxu0 }
 0x1a6   : > { %v2356_v39 = vadd.f32 %v559_v37, %v2293_v52  ;;  %v561_v40 = vpop.f32.mrb[15].mxu0 }
 0x1a7   : > { %v2359_v41 = vadd.f32 %v561_v40, %v2295_v53  ;;  %v622_v42 = vmax.f32 %v2348_v33, %v2352_v36 }
 0x1a9   : > { %623 = vmax.xlane.f32.xlu0 %v622_v42  ;;  %v625_v44 = vmax.f32 %v2356_v39, %v2359_v41 }
 0x1ab   : > { %v565_v46 = vpop.f32.mrb[16].mxu0  ;;  %626 = vmax.xlane.f32.xlu1 %v625_v44 }
 0x1ac   : > { %v2368_v47 = vadd.f32 %v565_v46, %v2293_v52  ;;  %v567_v48 = vpop.f32.mrb[17].mxu0 }
 0x1ad   : > { %v2372_v50 = vadd.f32 %v567_v48, %v2295_v53  ;;  %v569_v51 = vpop.f32.mrb[18].mxu0 }
 0x1ae   : > { %v2376_v56 = vadd.f32 %v569_v51, %v2293_v52  ;;  %v571_v58 = vpop.f32.mrb[19].mxu0 }
 0x1af   : > { %v2379_v59 = vadd.f32 %v571_v58, %v2295_v53  ;;  %v628_v62 = vmax.f32 %v2368_v47, %v2372_v50 }
 0x1b1   : > { %629 = vmax.xlane.f32.xlu0 %v628_v62  ;;  %v631_v0 = vmax.f32 %v2376_v56, %v2379_v59 }
 0x1b3   : > { %v575_v4 = vpop.f32.mrb[20].mxu0  ;;  %632 = vmax.xlane.f32.xlu1 %v631_v0 }
 0x1b4   : > { %v2388_v5 = vadd.f32 %v575_v4, %v2293_v52  ;;  %v577_v8 = vpop.f32.mrb[21].mxu0 }
 0x1b5   : > { %v2391_v9 = vadd.f32 %v577_v8, %v2295_v53  ;;  %v579_v10 = vpop.f32.mrb[22].mxu0 }
 0x1b6   : > { %v2394_v12 = vadd.f32 %v579_v10, %v2293_v52  ;;  %v581_v14 = vpop.f32.mrb[23].mxu0 }
 0x1b7   : > { %v2397_v16 = vadd.f32 %v581_v14, %v2295_v53  ;;  %v634_v22 = vmax.f32 %v2388_v5, %v2391_v9 }
 0x1b9   : > { %635 = vmax.xlane.f32.xlu0 %v634_v22  ;;  %v637_v25 = vmax.f32 %v2394_v12, %v2397_v16 }
 0x1bb   : > { %v585_v28 = vpop.f32.mrb[24].mxu0  ;;  %638 = vmax.xlane.f32.xlu1 %v637_v25 }
 0x1bc   : > { %v2404_v31 = vadd.f32 %v585_v28, %v2293_v52  ;;  %v587_v32 = vpop.f32.mrb[25].mxu0 }
 0x1bd   : > { %v2407_v34 = vadd.f32 %v587_v32, %v2295_v53  ;;  %v589_v35 = vpop.f32.mrb[26].mxu0 }
 0x1be   : > { %v2410_v37 = vadd.f32 %v589_v35, %v2293_v52  ;;  %v591_v38 = vpop.f32.mrb[27].mxu0 }
 0x1bf   : > { %v2413_v40 = vadd.f32 %v591_v38, %v2295_v53  ;;  %v640_v42 = vmax.f32 %v2404_v31, %v2407_v34 }
 0x1c1   : > { %641 = vmax.xlane.f32.xlu0 %v640_v42  ;;  %v643_v43 = vmax.f32 %v2410_v37, %v2413_v40 }
 0x1c3   : > { %v595_v44 = vpop.f32.mrb[28].mxu0  ;;  %644 = vmax.xlane.f32.xlu1 %v643_v43 }
 0x1c4   : > { %v2420_v45 = vadd.f32 %v595_v44, %v2293_v52  ;;  %v597_v46 = vpop.f32.mrb[29].mxu0 }
 0x1c5   : > { %v2423_v48 = vadd.f32 %v597_v46, %v2295_v53  ;;  %v599_v49 = vpop.f32.mrb[30].mxu0 }
 0x1c6   : > { %v2426_v51 = vadd.f32 %v599_v49, %v2293_v52  ;;  %v601_v54 = vpop.f32.mrb[31].mxu0 }
 0x1c7   : > { %v2429_v58 = vadd.f32 %v601_v54, %v2295_v53  ;;  %v646_v62 = vmax.f32 %v2420_v45, %v2423_v48 }
 0x1c9   : > { %647 = vmax.xlane.f32.xlu0 %v646_v62  ;;  %v649_v63 = vmax.f32 %v2426_v51, %v2429_v58 }
 0x1cb   : > { %650 = vmax.xlane.f32.xlu1 %v649_v63 }
 0x21e   : > { %v606_v0 = vpop.xlane.xlu0 %605 }
 0x21f   : > { %v652_v2 = vsub.f32 %v2298_v55, %v606_v0  ;;  %v653_v4 = vsub.f32 %v2301_v57, %v606_v0 }
 0x221   : > { %v684_v8 = vmul.f32 1.442695, %v652_v2  ;;  %v686_v52 = vmul.f32 1.442695, %v653_v4 }
 0x222   : > { %v609_v10 = vpop.xlane.xlu0 %608 }
 0x223   : > { %1563 = vpow2.f32 %v684_v8  ;;  %v654_v53 = vsub.f32 %v2304_v60, %v609_v10  ;;  %v655_v14 = vsub.f32 %v2307_v61, %v609_v10 }
 0x224   : > { %1565 = vpow2.f32 %v686_v52 }
 0x225   : > { %v688_v22 = vmul.f32 1.442695, %v654_v53  ;;  %v690_v25 = vmul.f32 1.442695, %v655_v14 }
 0x226   : > { %v612_v28 = vpop.xlane.xlu1 %611 }
 0x227   : > { %1567 = vpow2.f32 %v688_v22  ;;  %v656_v32 = vsub.f32 %v2314_v1, %v612_v28  ;;  %v657_v35 = vsub.f32 %v2317_v3, %v612_v28 }
 0x228   : > { %1569 = vpow2.f32 %v690_v25 }
 0x229   : > { %v692_v55 = vmul.f32 1.442695, %v656_v32  ;;  %v694_v57 = vmul.f32 1.442695, %v657_v35 }
 0x22a   : > { %v615_v38 = vpop.xlane.xlu1 %614 }
 0x22b   : > { %1571 = vpow2.f32 %v692_v55  ;;  %v658_v42 = vsub.f32 %v2320_v6, %v615_v38  ;;  %v659_v60 = vsub.f32 %v2323_v7, %v615_v38 }
 0x22c   : > { %1573 = vpow2.f32 %v694_v57 }
 0x22d   : > { %v1564_v61 = vpop.eup %1563  ;;  %v696_v43 = vmul.f32 1.442695, %v658_v42  ;;  %v698_v44 = vmul.f32 1.442695, %v659_v60 }
 0x22e   : > { %v1566_v46 = vpop.eup %1565  ;;  %v618_v49 = vpop.xlane.xlu0 %617 }
 0x22f   : > { %1575 = vpow2.f32 %v696_v43  ;;  %v660_v1 = vsub.f32 %v2330_v11, %v618_v49  ;;  %v661_v3 = vsub.f32 %v2333_v13, %v618_v49  ;;  %v748_v54 = vadd.f32 %v1566_v46, %v1564_v61 }
 0x230   : > { %1577 = vpow2.f32 %v698_v44  ;;  %v621_v62 = vpop.xlane.xlu1 %620 }
 0x231   : > { %v1568_v63 = vpop.eup %1567  ;;  %v700_v0 = vmul.f32 1.442695, %v660_v1  ;;  %v702_v2 = vmul.f32 1.442695, %v661_v3  ;;  %v662_v6 = vsub.f32 %v2336_v15, %v621_v62  ;;  %v663_v7 = vsub.f32 %v2339_v19, %v621_v62  ;;  %749 = vadd.xlane.f32.xlu0 %v748_v54 }
 0x232   : > { %v1570_v4 = vpop.eup %1569  ;;  %v796_v8 = vpack.c.bf16 %v1568_v63, %v1564_v61 }
 0x233   : > { %1579 = vpow2.f32 %v700_v0  ;;  %v704_v52 = vmul.f32 1.442695, %v662_v6  ;;  %v706_v10 = vmul.f32 1.442695, %v663_v7  ;;  %v797_v53 = vpack.c.bf16 %v1570_v4, %v1566_v46 }
 0x234   : > { %1581 = vpow2.f32 %v702_v2  ;;  %v751_v11 = vadd.f32 %v1570_v4, %v1568_v63 }
 0x235   : > { %v1572_v13 = vpop.eup %1571  ;;  %1583 = vpow2.f32 %v704_v52  ;;  %972 = vmatprep.mubr.bf16.mxu1 %v797_v53 }
 0x236   : > { %v1574_v14 = vpop.eup %1573  ;;  %1585 = vpow2.f32 %v706_v10  ;;  %752 = vadd.xlane.f32.xlu1 %v751_v11  ;;  %973 = vmatmul.mubr.bf16.vlgmr.msra.gmra.mrb[0].mxu1 %v796_v8  ;;  %v624_v22 = vpop.xlane.xlu0 %623 }
 0x237   : > { %v664_v15 = vsub.f32 %v2348_v33, %v624_v22  ;;  %v665_v19 = vsub.f32 %v2352_v36, %v624_v22  ;;  %v754_v25 = vadd.f32 %v1574_v14, %v1572_v13 }
 0x238   : > { %v627_v28 = vpop.xlane.xlu1 %626 }
 0x239   : > { %v1576_v32 = vpop.eup %1575  ;;  %v708_v35 = vmul.f32 1.442695, %v664_v15  ;;  %v710_v55 = vmul.f32 1.442695, %v665_v19  ;;  %v666_v57 = vsub.f32 %v2356_v39, %v627_v28  ;;  %v667_v38 = vsub.f32 %v2359_v41, %v627_v28  ;;  %755 = vadd.xlane.f32.xlu0 %v754_v25 }
 0x23a   : > { %v1578_v42 = vpop.eup %1577  ;;  %v798_v60 = vpack.c.bf16 %v1576_v32, %v1572_v13 }
 0x23b   : > { %1587 = vpow2.f32 %v708_v35  ;;  %v712_v61 = vmul.f32 1.442695, %v666_v57  ;;  %v714_v43 = vmul.f32 1.442695, %v667_v38  ;;  %v799_v44 = vpack.c.bf16 %v1578_v42, %v1574_v14 }
 0x23c   : > { %1589 = vpow2.f32 %v710_v55  ;;  %v757_v33 = vadd.f32 %v1578_v42, %v1576_v32 }
 0x23d   : > { %v1580_v46 = vpop.eup %1579  ;;  %1591 = vpow2.f32 %v712_v61  ;;  %980 = vmatprep.mubr.bf16.mxu1 %v799_v44 }
 0x23e   : > { %v1582_v36 = vpop.eup %1581  ;;  %1593 = vpow2.f32 %v714_v43  ;;  %758 = vadd.xlane.f32.xlu1 %v757_v33  ;;  %981 = vmatmul.mubr.bf16.gmra.mrb[4].mxu1 %v798_v60  ;;  %v630_v49 = vpop.xlane.xlu0 %629 }
 0x23f   : > { %v1584_v39 = vpop.eup %1583  ;;  %v668_v41 = vsub.f32 %v2368_v47, %v630_v49  ;;  %v669_v1 = vsub.f32 %v2372_v50, %v630_v49  ;;  %v760_v3 = vadd.f32 %v1582_v36, %v1580_v46 }
 0x240   : > { %v1586_v54 = vpop.eup %1585  ;;  %v633_v62 = vpop.xlane.xlu1 %632  ;;  %v800_v47 = vpack.c.bf16 %v1584_v39, %v1580_v46 }
 0x241   : > { %v716_v63 = vmul.f32 1.442695, %v668_v41  ;;  %v718_v0 = vmul.f32 1.442695, %v669_v1  ;;  %v670_v2 = vsub.f32 %v2376_v56, %v633_v62  ;;  %v671_v6 = vsub.f32 %v2379_v59, %v633_v62  ;;  %761 = vadd.xlane.f32.xlu0 %v760_v3 }
 0x242   : > { %v763_v7 = vadd.f32 %v1586_v54, %v1584_v39  ;;  %v801_v4 = vpack.c.bf16 %v1586_v54, %v1582_v36 }
 0x243   : > { %1595 = vpow2.f32 %v716_v63  ;;  %v720_v8 = vmul.f32 1.442695, %v670_v2  ;;  %v722_v52 = vmul.f32 1.442695, %v671_v6 }
 0x244   : > { %1597 = vpow2.f32 %v718_v0  ;;  %764 = vadd.xlane.f32.xlu1 %v763_v7  ;;  %988 = vmatprep.mubr.bf16.mxu1 %v801_v4 }
 0x245   : > { %v1588_v50 = vpop.eup %1587  ;;  %1599 = vpow2.f32 %v720_v8 }
 0x246   : > { %v1590_v10 = vpop.eup %1589  ;;  %1601 = vpow2.f32 %v722_v52  ;;  %989 = vmatmul.mubr.bf16.gmra.mrb[8].mxu1 %v800_v47  ;;  %v636_v53 = vpop.xlane.xlu0 %635 }
 0x247   : > { %v1592_v11 = vpop.eup %1591  ;;  %v672_v56 = vsub.f32 %v2388_v5, %v636_v53  ;;  %v673_v59 = vsub.f32 %v2391_v9, %v636_v53  ;;  %v766_v13 = vadd.f32 %v1590_v10, %v1588_v50 }
 0x248   : > { %v1594_v14 = vpop.eup %1593  ;;  %v639_v22 = vpop.xlane.xlu1 %638  ;;  %v802_v5 = vpack.c.bf16 %v1592_v11, %v1588_v50 }
 0x249   : > { %v724_v15 = vmul.f32 1.442695, %v672_v56  ;;  %v726_v19 = vmul.f32 1.442695, %v673_v59  ;;  %v674_v25 = vsub.f32 %v2394_v12, %v639_v22  ;;  %v675_v28 = vsub.f32 %v2397_v16, %v639_v22  ;;  %767 = vadd.xlane.f32.xlu0 %v766_v13 }
 0x24a   : > { %v769_v32 = vadd.f32 %v1594_v14, %v1592_v11  ;;  %v803_v35 = vpack.c.bf16 %v1594_v14, %v1590_v10 }
 0x24b   : > { %1603 = vpow2.f32 %v724_v15  ;;  %v728_v55 = vmul.f32 1.442695, %v674_v25  ;;  %v730_v57 = vmul.f32 1.442695, %v675_v28 }
 0x24c   : > { %1605 = vpow2.f32 %v726_v19  ;;  %770 = vadd.xlane.f32.xlu1 %v769_v32  ;;  %996 = vmatprep.mubr.bf16.mxu1 %v803_v35 }
 0x24d   : > { %v1596_v9 = vpop.eup %1595  ;;  %1607 = vpow2.f32 %v728_v55 }
 0x24e   : > { %v1598_v38 = vpop.eup %1597  ;;  %1609 = vpow2.f32 %v730_v57  ;;  %997 = vmatmul.mubr.bf16.gmra.mrb[12].mxu1 %v802_v5  ;;  %v642_v42 = vpop.xlane.xlu0 %641 }
 0x24f   : > { %v1600_v60 = vpop.eup %1599  ;;  %v676_v12 = vsub.f32 %v2404_v31, %v642_v42  ;;  %v677_v16 = vsub.f32 %v2407_v34, %v642_v42  ;;  %v772_v61 = vadd.f32 %v1598_v38, %v1596_v9 }
 0x250   : > { %v1602_v43 = vpop.eup %1601  ;;  %v645_v44 = vpop.xlane.xlu1 %644  ;;  %v804_v31 = vpack.c.bf16 %v1600_v60, %v1596_v9 }
 0x251   : > { %v732_v33 = vmul.f32 1.442695, %v676_v12  ;;  %v734_v46 = vmul.f32 1.442695, %v677_v16  ;;  %v678_v36 = vsub.f32 %v2410_v37, %v645_v44  ;;  %v679_v49 = vsub.f32 %v2413_v40, %v645_v44  ;;  %773 = vadd.xlane.f32.xlu0 %v772_v61 }
 0x252   : > { %v775_v39 = vadd.f32 %v1602_v43, %v1600_v60  ;;  %v805_v41 = vpack.c.bf16 %v1602_v43, %v1598_v38  ;;  %v2467_v43 = vstv %s1053_s9  ;;  %s1761_s9 = scalar_lea.vmem %s1760_s6, 4096 }
 0x253   : > { %1611 = vpow2.f32 %v732_v33  ;;  %v736_v1 = vmul.f32 1.442695, %v678_v36  ;;  %v738_v3 = vmul.f32 1.442695, %v679_v49  ;;  %p1763_p6 = scmp.lt.s32.totalorder %s1761_s9, %s1755_s4 }
 0x254   : > { %1613 = vpow2.f32 %v734_v46  ;;  %776 = vadd.xlane.f32.xlu1 %v775_v39  ;;  %1004 = vmatprep.mubr.bf16.mxu1 %v805_v41 }
 0x255   : > { %v1604_v34 = vpop.eup %1603  ;;  %1615 = vpow2.f32 %v736_v1  ;;  %p1764_p5 = por %p1763_p6, %p1762_p9 }
 0x256   : > { %v1606_v54 = vpop.eup %1605  ;;  %1617 = vpow2.f32 %v738_v3  ;;  %1005 = vmatmul.mubr.bf16.gmra.mrb[16].mxu1 %v804_v31  ;;  %v648_v62 = vpop.xlane.xlu0 %647 }
 0x257   : > { %v1608_v63 = vpop.eup %1607  ;;  %v680_v37 = vsub.f32 %v2420_v45, %v648_v62  ;;  %v681_v40 = vsub.f32 %v2423_v48, %v648_v62  ;;  %v778_v0 = vadd.f32 %v1606_v54, %v1604_v34  ;;  %p1765_p0 = pnand %p1764_p5, %p1758_p2 }
 0x258   : > { %v1610_v2 = vpop.eup %1609  ;;  %v651_v6 = vpop.xlane.xlu1 %650  ;;  %v806_v45 = vpack.c.bf16 %v1608_v63, %v1604_v34 }
 0x259   : > { %v740_v7 = vmul.f32 1.442695, %v680_v37  ;;  %v742_v4 = vmul.f32 1.442695, %v681_v40  ;;  %v682_v8 = vsub.f32 %v2426_v51, %v651_v6  ;;  %v683_v52 = vsub.f32 %v2429_v58, %v651_v6  ;;  %779 = vadd.xlane.f32.xlu0 %v778_v0 }
 0x25a   : > { %v781_v47 = vadd.f32 %v1610_v2, %v1608_v63  ;;  %v807_v50 = vpack.c.bf16 %v1610_v2, %v1606_v54 }
 0x25b   : > { %1619 = vpow2.f32 %v740_v7  ;;  %v744_v10 = vmul.f32 1.442695, %v682_v8  ;;  %v746_v53 = vmul.f32 1.442695, %v683_v52 }
 0x25c   : > { %1621 = vpow2.f32 %v742_v4  ;;  %782 = vadd.xlane.f32.xlu1 %v781_v47  ;;  %1012 = vmatprep.mubr.bf16.mxu1 %v807_v50 }
 0x25d   : > { %v1612_v48 = vpop.eup %1611  ;;  %1623 = vpow2.f32 %v744_v10 }
 0x25e   : > { %v1614_v11 = vpop.eup %1613  ;;  %1625 = vpow2.f32 %v746_v53  ;;  %1013 = vmatmul.mubr.bf16.gmra.mrb[20].mxu1 %v806_v45 }
 0x25f   : > { %v1616_v56 = vpop.eup %1615  ;;  %v784_v59 = vadd.f32 %v1614_v11, %v1612_v48 }
 0x260   : > { %v1618_v51 = vpop.eup %1617  ;;  %v808_v14 = vpack.c.bf16 %v1616_v56, %v1612_v48 }
 0x261   : > { %785 = vadd.xlane.f32.xlu0 %v784_v59  ;;  %v787_v58 = vadd.f32 %v1618_v51, %v1616_v56  ;;  %v809_v13 = vpack.c.bf16 %v1618_v51, %v1614_v11 }
 0x263   : > { %788 = vadd.xlane.f32.xlu1 %v787_v58  ;;  %1020 = vmatprep.mubr.bf16.mxu1 %v809_v13 }
 0x265   : > { %v1620_v22 = vpop.eup %1619 }
 0x266   : > { %v1622_v15 = vpop.eup %1621  ;;  %1021 = vmatmul.mubr.bf16.gmra.mrb[24].mxu1 %v808_v14 }
 0x267   : > { %v1624_v19 = vpop.eup %1623  ;;  %v790_v25 = vadd.f32 %v1622_v15, %v1620_v22 }
 0x268   : > { %v1626_v28 = vpop.eup %1625  ;;  %v810_v55 = vpack.c.bf16 %v1624_v19, %v1620_v22 }
 0x269   : > { %791 = vadd.xlane.f32.xlu0 %v790_v25  ;;  %v793_v32 = vadd.f32 %v1626_v28, %v1624_v19  ;;  %v811_v35 = vpack.c.bf16 %v1626_v28, %v1622_v15 }
 0x26b   : > { %794 = vadd.xlane.f32.xlu1 %v793_v32  ;;  %1028 = vmatprep.mubr.bf16.mxu1 %v811_v35 }
 0x26e   : > { %1029 = vmatmul.mubr.bf16.gmra.mrb[28].mxu1 %v810_v55 }
 0x2be   : > { %v750_v57 = vpop.xlane.xlu0 %749 }
 0x2bf   : > { %1627 = vrcp.f32 %v750_v57 }
 0x2c3   : > { %v753_v5 = vpop.xlane.xlu1 %752 }
 0x2c4   : > { %1629 = vrcp.f32 %v753_v5 }
 0x2c6   : > { %v756_v9 = vpop.xlane.xlu0 %755 }
 0x2c7   : > { %1631 = vrcp.f32 %v756_v9 }
 0x2c9   : > { %v1628_v61 = vpop.eup %1627 }
 0x2cb   : > { %v759_v38 = vpop.xlane.xlu1 %758 }
 0x2cc   : > { %1633 = vrcp.f32 %v759_v38 }
 0x2ce   : > { %v1630_v36 = vpop.eup %1629  ;;  %v762_v49 = vpop.xlane.xlu0 %761 }
 0x2cf   : > { %1635 = vrcp.f32 %v762_v49 }
 0x2d1   : > { %v765_v1 = vpop.xlane.xlu1 %764  ;;  %v1632_v40 = vpop.eup %1631 }
 0x2d2   : > { %1637 = vrcp.f32 %v765_v1 }
 0x2d6   : > { %v1634_v6 = vpop.eup %1633  ;;  %v768_v7 = vpop.xlane.xlu0 %767 }
 0x2d7   : > { %1639 = vrcp.f32 %v768_v7 }
 0x2d9   : > { %v771_v52 = vpop.xlane.xlu1 %770  ;;  %v1636_v11 = vpop.eup %1635 }
 0x2da   : > { %1641 = vrcp.f32 %v771_v52 }
 0x2dc   : > { %v1638_v58 = vpop.eup %1637 }
 0x2de   : > { %v774_v13 = vpop.xlane.xlu0 %773 }
 0x2df   : > { %1643 = vrcp.f32 %v774_v13 }
 0x2e1   : > { %v777_v22 = vpop.xlane.xlu1 %776  ;;  %v1640_v55 = vpop.eup %1639 }
 0x2e2   : > { %1645 = vrcp.f32 %v777_v22 }
 0x2e4   : > { %v1642_v38 = vpop.eup %1641 }
 0x2e9   : > { %v1644_v49 = vpop.eup %1643 }
 0x309   : > { %v1356_v42 = vpop.f32.mrb[0].mxu1 }
 0x30a   : > { %v1357_v60 = vpop.f32.mrb[1].mxu1 }
 0x30b   : > { %v1358_v12 = vadd.f32 %v1357_v60, %v1356_v42  ;;  %v1359_v16 = vpop.f32.mrb[2].mxu1  ;;  %v780_v42 = vpop.xlane.xlu0 %779 }
 0x30c   : > { %v1360_v44 = vpop.f32.mrb[3].mxu1  ;;  %1647 = vrcp.f32 %v780_v42 }
 0x30d   : > { %v1054_v33 = vmul.f32 %v1628_v61, %v1358_v12  ;;  %v1361_v46 = vadd.f32 %v1360_v44, %v1359_v16  ;;  %v783_v12 = vpop.xlane.xlu1 %782 }
 0x30e   : > { %1649 = vrcp.f32 %v783_v12 }
 0x30f   : > { %v1071_v39 = vmul.f32 %v2467_v43, %v1054_v33  ;;  %v1055_v41 = vmul.f32 %v1630_v36, %v1361_v46 }
 0x311   : > { %v1087_v3 = vadd.f32 %v1071_v39, %v2227_v17  ;;  %v1072_v31 = vmul.f32 %v2467_v43, %v1055_v41  ;;  %v1362_v34 = vpop.f32.mrb[4].mxu1 }
 0x312   : > { %v1363_v54 = vpop.f32.mrb[5].mxu1 }
 0x313   : > { %1103 = vst [vmem:[%s2474_s18] sm:$0xff] %v1087_v3  ;;  %v1088_v62 = vadd.f32 %v1072_v31, %v2230_v18  ;;  %v1364_v63 = vadd.f32 %v1363_v54, %v1362_v34  ;;  %v1365_v37 = vpop.f32.mrb[6].mxu1  ;;  %v1646_v3 = vpop.eup %1645 }
 0x314   : > { %v1366_v0 = vpop.f32.mrb[7].mxu1  ;;  %v786_v31 = vpop.xlane.xlu0 %785 }
 0x315   : > { %1104 = vst [vmem:[%s2474_s18 + $0x8] sm:$0xff] %v1088_v62  ;;  %v1056_v17 = vmul.f32 %v1632_v40, %v1364_v63  ;;  %v1367_v2 = vadd.f32 %v1366_v0, %v1365_v37  ;;  %v789_v54 = vpop.xlane.xlu1 %788  ;;  %1651 = vrcp.f32 %v786_v31 }
 0x316   : > { %1653 = vrcp.f32 %v789_v54 }
 0x317   : > { %v1073_v4 = vmul.f32 %v2467_v43, %v1056_v17  ;;  %v1057_v8 = vmul.f32 %v1634_v6, %v1367_v2  ;;  %v1648_v2 = vpop.eup %1647 }
 0x319   : > { %v1089_v47 = vadd.f32 %v1073_v4, %v2236_v20  ;;  %v1074_v18 = vmul.f32 %v2467_v43, %v1057_v8  ;;  %v1368_v50 = vpop.f32.mrb[8].mxu1  ;;  %v792_v8 = vpop.xlane.xlu0 %791 }
 0x31a   : > { %v1369_v10 = vpop.f32.mrb[9].mxu1  ;;  %1655 = vrcp.f32 %v792_v8 }
 0x31b   : > { %1105 = vst [vmem:[%s2474_s18 + $0x10] sm:$0xff] %v1089_v47  ;;  %v1090_v53 = vadd.f32 %v1074_v18, %v2239_v21  ;;  %v1370_v45 = vadd.f32 %v1369_v10, %v1368_v50  ;;  %v1371_v48 = vpop.f32.mrb[10].mxu1  ;;  %v795_v18 = vpop.xlane.xlu1 %794  ;;  %v1659_v50 = vld [vmem:[%s2192_s7 + $0x50] sm:$0xff] }
 0x31c   : > { %v1372_v56 = vpop.f32.mrb[11].mxu1  ;;  %1657 = vrcp.f32 %v795_v18 }
 0x31d   : > { %1106 = vst [vmem:[%s2474_s18 + $0x18] sm:$0xff] %v1090_v53  ;;  %v1058_v59 = vmul.f32 %v1636_v11, %v1370_v45  ;;  %v1373_v51 = vadd.f32 %v1372_v56, %v1371_v48  ;;  %v1660_v48 = vld [vmem:[%s2192_s7 + $0x58] sm:$0xff] }
 0x31f   : > { %v1075_v20 = vmul.f32 %v2467_v43, %v1058_v59  ;;  %v1059_v14 = vmul.f32 %v1638_v58, %v1373_v51 }
 0x321   : > { %v1091_v15 = vadd.f32 %v1075_v20, %v2245_v23  ;;  %v1076_v21 = vmul.f32 %v2467_v43, %v1059_v14  ;;  %v1374_v19 = vpop.f32.mrb[12].mxu1 }
 0x322   : > { %v1375_v25 = vpop.f32.mrb[13].mxu1 }
 0x323   : > { %1107 = vst [vmem:[%s2474_s18 + $0x20] sm:$0xff] %v1091_v15  ;;  %v1092_v28 = vadd.f32 %v1076_v21, %v2248_v24  ;;  %v1376_v32 = vadd.f32 %v1375_v25, %v1374_v19  ;;  %v1377_v35 = vpop.f32.mrb[14].mxu1  ;;  %v1661_v21 = vld [vmem:[%s2192_s7 + $0x60] sm:$0xff] }
 0x324   : > { %v1378_v57 = vpop.f32.mrb[15].mxu1 }
 0x325   : > { %1108 = vst [vmem:[%s2474_s18 + $0x28] sm:$0xff] %v1092_v28  ;;  %v1060_v5 = vmul.f32 %v1640_v55, %v1376_v32  ;;  %v1379_v9 = vadd.f32 %v1378_v57, %v1377_v35  ;;  %v1662_v35 = vld [vmem:[%s2192_s7 + $0x68] sm:$0xff] }
 0x327   : > { %v1077_v23 = vmul.f32 %v2467_v43, %v1060_v5  ;;  %v1061_v60 = vmul.f32 %v1642_v38, %v1379_v9 }
 0x329   : > { %v1093_v16 = vadd.f32 %v1077_v23, %v2254_v26  ;;  %v1078_v24 = vmul.f32 %v2467_v43, %v1061_v60  ;;  %v1380_v61 = vpop.f32.mrb[16].mxu1 }
 0x32a   : > { %v1381_v44 = vpop.f32.mrb[17].mxu1 }
 0x32b   : > { %1109 = vst [vmem:[%s2474_s18 + $0x30] sm:$0xff] %v1093_v16  ;;  %v1094_v33 = vadd.f32 %v1078_v24, %v2257_v27  ;;  %v1382_v46 = vadd.f32 %v1381_v44, %v1380_v61  ;;  %v1383_v36 = vpop.f32.mrb[18].mxu1  ;;  %v1663_v24 = vld [vmem:[%s2192_s7 + $0x70] sm:$0xff] }
 0x32c   : > { %v1384_v39 = vpop.f32.mrb[19].mxu1 }
 0x32d   : > { %1110 = vst [vmem:[%s2474_s18 + $0x38] sm:$0xff] %v1094_v33  ;;  %v1062_v41 = vmul.f32 %v1644_v49, %v1382_v46  ;;  %v1385_v1 = vadd.f32 %v1384_v39, %v1383_v36  ;;  %v1664_v33 = vld [vmem:[%s2192_s7 + $0x78] sm:$0xff] }
 0x32f   : > { %v1079_v26 = vmul.f32 %v2467_v43, %v1062_v41  ;;  %v1063_v34 = vmul.f32 %v1646_v3, %v1385_v1 }
 0x331   : > { %v1095_v62 = vadd.f32 %v1079_v26, %v2263_v29  ;;  %v1080_v27 = vmul.f32 %v2467_v43, %v1063_v34  ;;  %v1386_v63 = vpop.f32.mrb[20].mxu1  ;;  %v1650_v29 = vpop.eup %1649 }
 0x332   : > { %v1387_v37 = vpop.f32.mrb[21].mxu1  ;;  %v1652_v51 = vpop.eup %1651 }
 0x333   : > { %1111 = vst [vmem:[%s2474_s18 + $0x40] sm:$0xff] %v1095_v62  ;;  %v1096_v40 = vadd.f32 %v1080_v27, %v2266_v30  ;;  %v1388_v0 = vadd.f32 %v1387_v37, %v1386_v63  ;;  %v1389_v17 = vpop.f32.mrb[22].mxu1  ;;  %v1654_v14 = vpop.eup %1653 }
 0x334   : > { %v1390_v6 = vpop.f32.mrb[23].mxu1  ;;  %v1656_v9 = vpop.eup %1655 }
 0x335   : > { %1112 = vst [vmem:[%s2474_s18 + $0x48] sm:$0xff] %v1096_v40  ;;  %v1064_v7 = vmul.f32 %v1648_v2, %v1388_v0  ;;  %v1391_v4 = vadd.f32 %v1390_v6, %v1389_v17  ;;  %v1658_v60 = vpop.eup %1657 }
 0x337   : > { %v1081_v52 = vmul.f32 %v2467_v43, %v1064_v7  ;;  %v1065_v47 = vmul.f32 %v1650_v29, %v1391_v4 }
 0x339   : > { %v1097_v10 = vadd.f32 %v1659_v50, %v1081_v52  ;;  %v1082_v30 = vmul.f32 %v2467_v43, %v1065_v47  ;;  %v1392_v53 = vpop.f32.mrb[24].mxu1 }
 0x33a   : > { %v1393_v45 = vpop.f32.mrb[25].mxu1 }
 0x33b   : > { %1113 = vst [vmem:[%s2474_s18 + $0x50] sm:$0xff] %v1097_v10  ;;  %v1098_v11 = vadd.f32 %v1660_v48, %v1082_v30  ;;  %v1394_v56 = vadd.f32 %v1393_v45, %v1392_v53  ;;  %v1395_v59 = vpop.f32.mrb[26].mxu1 }
 0x33c   : > { %v1396_v58 = vpop.f32.mrb[27].mxu1 }
 0x33d   : > { %1114 = vst [vmem:[%s2474_s18 + $0x58] sm:$0xff] %v1098_v11  ;;  %v1066_v13 = vmul.f32 %v1652_v51, %v1394_v56  ;;  %v1397_v20 = vadd.f32 %v1396_v58, %v1395_v59 }
 0x33f   : > { %v1083_v22 = vmul.f32 %v2467_v43, %v1066_v13  ;;  %v1067_v15 = vmul.f32 %v1654_v14, %v1397_v20 }
 0x341   : > { %v1099_v19 = vadd.f32 %v1661_v21, %v1083_v22  ;;  %v1084_v25 = vmul.f32 %v2467_v43, %v1067_v15  ;;  %v1398_v28 = vpop.f32.mrb[28].mxu1 }
 0x342   : > { %v1399_v32 = vpop.f32.mrb[29].mxu1 }
 0x343   : > { %1115 = vst [vmem:[%s2474_s18 + $0x60] sm:$0xff] %v1099_v19  ;;  %v1100_v55 = vadd.f32 %v1662_v35, %v1084_v25  ;;  %v1400_v57 = vadd.f32 %v1399_v32, %v1398_v28  ;;  %v1401_v5 = vpop.f32.mrb[30].mxu1 }
 0x344   : > { %v1402_v38 = vpop.f32.mrb[31].mxu1 }
 0x345   : > { %1116 = vst [vmem:[%s2474_s18 + $0x68] sm:$0xff] %v1100_v55  ;;  %v1068_v42 = vmul.f32 %v1656_v9, %v1400_v57  ;;  %v1403_v23 = vadd.f32 %v1402_v38, %v1401_v5 }
 0x347   : > { %v1085_v12 = vmul.f32 %v2467_v43, %v1068_v42  ;;  %v1069_v16 = vmul.f32 %v1658_v60, %v1403_v23 }
 0x349   : > { %v1101_v61 = vadd.f32 %v1663_v24, %v1085_v12  ;;  %v1086_v44 = vmul.f32 %v2467_v43, %v1069_v16 }
 0x34b   : > { %1117 = vst [vmem:[%s2474_s18 + $0x70] sm:$0xff] %v1101_v61  ;;  %v1102_v46 = vadd.f32 %v1664_v33, %v1086_v44 }
 0x34d   : > { %1118 = vst [vmem:[%s2474_s18 + $0x78] sm:$0xff] %v1102_v46 }
 0x34e   : > { %1768 = shalt.err (!%p1765_p0)
}
 0x34f   : > { %s1769_s7 = scalar_lea.hbm %s2524_s21, 2048  ;;  %s1773_s10 = scalar_lea.hbm %s2659_s16, 8192 }
 0x350   : > { %p1770_p12 = scmp.ne.s32.totalorder %s2524_s21, %s1769_s7  ;;  %p1774_p3 = scmp.lt.u32.totalorder %s2524_s21, %s2659_s16 }
 0x351   : > { %p1775_p7 = scmp.lt.u32.totalorder %s1773_s10, %s1769_s7  ;;  %p1777_p13 = scmp.lt.u32.totalorder %s1769_s7, %s2524_s21 }
 0x352   : > { %p1771_p11 = pnand %p1770_p12, %p2660_p10 }
 0x353   : > { %p1776_p8 = por %p1775_p7, %p1774_p3 }
 0x354   : > { %p1772_p1 = pneg %p1771_p11 }
 0x355   : > { %p1778_p4 = por %p1777_p13, %p1776_p8 }
 0x357   : > { %p1779_p2 = pnand %p1778_p4, %p1772_p1 }
 0x359   : > { %1782 = shalt.err (!%p1779_p2)
}
 0x35a   : > { %s1892_s15 = smov 128   ;;  %s1893_s19 = smov 8  }
 0x35b   : > { %1410 = dma.vmem_to_hbm [thread:$0]  (%p2660_p10), %s2526_s17, 2048, %s2524_s21, %s1120_s23, %s1892_s15, %s1892_s15, %s1893_s19  }
 0x35c PF: > { %s2661_s12 = sld [smem:[#allocation14_spill]]  ;;  %s2662_s26 = sld [smem:[#allocation21_spill]] }
 0x35d   : > { %p1427_p9 = scmp.ge.s32.totalorder %s1881_s29, 2 }
 0x362   : > { %s1150_s4 = sand.u32 1, %s2661_s12   ;;  %p2663_p6 = scmp.ne.s32.totalorder %s2662_s26, 0 }
 0x363   : > { %s1151_s1 = scalar_lea.sflag [#allocation5], %s1150_s4 }
 0x364   : > { %p1423_p5 = pnand %p1427_p9, %p2663_p6 }
 0x366   : > { %1836 = dma.done.wait (!%p1423_p5), %s1151_s1, 2048  }
 0x367   : > { %1838 = vsyncadd (!%p1423_p5), %s1151_s1, 4294965248  ;;  %s25_s29 = sadd.s32 1, %s1881_s29   ;;  %s2664_s20 = sld [smem:[#allocation13_spill]] }
 0x368   : > { %p22_p0 = scmp.ge.s32.totalorder %s25_s29, 6   ;;  %s2665_s30 = sld [smem:[#allocation19_spill]] }
 0x369   : > { %s2666_s21 = smov %s1849_s22  ;;  %s2667_s22 = smov %s2106_s2 }
 0x36a   : > { %s2668_s23 = smov %s1857_s24  ;;  %s2669_s24 = smov %s1861_s25 }
 0x36b   : > { %s2670_s25 = smov %s2109_s5  ;;  %s2671_s26 = smov %s1873_s27 }
 0x36c   : > { %s2672_s4 = smov %s1877_s28  ;;  %s2674_s28 = smov %s2680_s11 }
 0x36d   :  { %24 = sbr.rel (!%p22_p0) target bundleno = 16 (0x10), region = 112 }
 0x36e   : > { %s2673_s27 = smov %s2665_s30 }
 0x374   :  { %1156 = vsyncpa [#allocation4], 1 }
 0x375   :  { %1158 = vsyncpa [#allocation4 + $0x1], 1 }
 0x376   :  { %1159 = vsyncpa [#allocation7], 1 }
 0x377   :  { %1161 = vsyncpa [#allocation7 + $0x1], 1 }
 0x378   :  { %1162 = vsyncpa [#allocation5], 1 }
 0x379   :  { %1164 = vsyncpa [#allocation5 + $0x1], 1 }

</bundles_post_ra>
